<compile_context>
chip_gen: v7x
topology: tpu7x:2x2x1
jax: 0.10.0
libtpu: 0.0.40
codegen_flags: <defaults>
</compile_context>

<pallas_src>
import functools

import jax
import jax.numpy as jnp
from jax.experimental import pallas as pl
from jax.experimental.pallas import tpu as pltpu

_VMEM_LIMIT_BYTES = 32 * 1024 * 1024  # safe on v5e/v6e/v7x (v7x physical VMEM is 64 MiB)


def _pick_tile(dim, preferred, align):
    """Largest tile <= preferred that divides dim and respects (8,128) alignment."""
    if dim <= preferred:
        return dim
    t = preferred
    while t > align and dim % t != 0:
        t //= 2
    return t if (dim % t == 0 and t % align == 0) else dim


# ---------------------------------------------------------------------------
# Kernel 1: fused tied linear "encoder" — reps = [q_hidden; p_hidden] @ W
# Tiled (M, N, K) matmul with fp32 accumulator scratch. (stand-in for lm_q == lm_p)
# ---------------------------------------------------------------------------
def _encode_kernel(x_ref, w_ref, o_ref, acc_ref):
    @pl.when(pl.program_id(2) == 0)
    def _init():
        acc_ref[...] = jnp.zeros_like(acc_ref)

    acc_ref[...] += jnp.dot(x_ref[...], w_ref[...],
                            preferred_element_type=jnp.float32)

    @pl.when(pl.program_id(2) == pl.num_programs(2) - 1)
    def _finalize():
        o_ref[...] = acc_ref[...].astype(o_ref.dtype)


def pallas_encode(x, w, *, tm=256, tn=256, tk=512):
    N, H = x.shape
    H2, D = w.shape
    assert H == H2
    tm = _pick_tile(N, tm, 8)     # row (sublane) tile
    tn = _pick_tile(D, tn, 128)   # rep / lane tile
    tk = _pick_tile(H, tk, 128)   # contraction tile (last dim of x block)
    return pl.pallas_call(
        _encode_kernel,
        out_shape=jax.ShapeDtypeStruct((N, D), jnp.float32),
        grid_spec=pltpu.PrefetchScalarGridSpec(
            num_scalar_prefetch=0,
            grid=(N // tm, D // tn, H // tk),           # reduction (K) axis last
            in_specs=[
                pl.BlockSpec((tm, tk), lambda i, j, k: (i, k)),
                pl.BlockSpec((tk, tn), lambda i, j, k: (k, j)),
            ],
            out_specs=pl.BlockSpec((tm, tn), lambda i, j, k: (i, j)),
            scratch_shapes=[pltpu.VMEM((tm, tn), jnp.float32)],
        ),
        compiler_params=pltpu.CompilerParams(
            dimension_semantics=("parallel", "parallel", "arbitrary"),
            vmem_limit_bytes=_VMEM_LIMIT_BYTES),
    )(x, w)


# ---------------------------------------------------------------------------
# Kernel 2 (training): fused similarity + cross-entropy with ONLINE logsumexp
# over passage tiles. No [Q, P] scores writeback; scalar loss goes to SMEM.
#   target[i] = i * (P // Q)   (static step)
#   loss = mean_i( logsumexp_j(scores[i, j]) - scores[i, target[i]] )
# ---------------------------------------------------------------------------
def _loss_kernel(q_ref, p_ref, loss_ref, m_sc, l_sc, t_sc, *, step, tp):
    j = pl.program_id(0)

    @pl.when(j == 0)
    def _init():
        m_sc[...] = jnp.full_like(m_sc, -jnp.inf)
        l_sc[...] = jnp.zeros_like(l_sc)
        t_sc[...] = jnp.zeros_like(t_sc)

    q = q_ref[...]                                  # [Q, D]  f32
    p = p_ref[...]                                  # [tp, D] f32
    # Contract on the last dim of BOTH operands -> no explicit p.T / XLU transpose.
    s = jax.lax.dot_general(q, p, (((1,), (1,)), ((), ())),
                            preferred_element_type=jnp.float32)   # [Q, tp]

    # online (flash-style) logsumexp over the P axis
    m_old = m_sc[...]
    m_new = jnp.maximum(m_old, jnp.max(s, axis=-1, keepdims=True))
    l_sc[...] = (jnp.exp(m_old - m_new) * l_sc[...]
                 + jnp.sum(jnp.exp(s - m_new), axis=-1, keepdims=True))
    m_sc[...] = m_new

    # accumulate the score at the (static-step) target column falling in this tile
    col = jax.lax.broadcasted_iota(jnp.int32, s.shape, 1) + j * tp
    row = jax.lax.broadcasted_iota(jnp.int32, s.shape, 0)
    hit = col == row * step
    t_sc[...] += jnp.sum(jnp.where(hit, s, jnp.float32(0.0)), axis=-1, keepdims=True)

    @pl.when(j == pl.num_programs(0) - 1)
    def _finalize():
        lse = m_sc[...] + jnp.log(l_sc[...])        # [Q, 1]
        loss_ref[0, 0] = jnp.mean(lse - t_sc[...])  # CrossEntropyLoss(reduction='mean')


def pallas_contrastive_loss(q_reps, p_reps, *, tp=512):
    Q, D = q_reps.shape
    P, D2 = p_reps.shape
    assert D == D2
    step = P // Q                                   # static (shape-derived), as in PyTorch
    tp = _pick_tile(P, tp, 8)
    kernel = functools.partial(_loss_kernel, step=step, tp=tp)
    loss = pl.pallas_call(
        kernel,
        out_shape=jax.ShapeDtypeStruct((1, 1), jnp.float32),
        grid_spec=pltpu.PrefetchScalarGridSpec(
            num_scalar_prefetch=0,
            grid=(P // tp,),
            in_specs=[
                pl.BlockSpec((Q, D), lambda j: (0, 0)),   # q_reps resident across P tiles
                pl.BlockSpec((tp, D), lambda j: (j, 0)),
            ],
            out_specs=pl.BlockSpec(memory_space=pltpu.MemorySpace.SMEM),
            scratch_shapes=[pltpu.VMEM((Q, 1), jnp.float32),   # running max
                            pltpu.VMEM((Q, 1), jnp.float32),   # running sum
                            pltpu.VMEM((Q, 1), jnp.float32)],  # target score
        ),
        compiler_params=pltpu.CompilerParams(
            dimension_semantics=("arbitrary",),       # accumulator across P tiles
            vmem_limit_bytes=_VMEM_LIMIT_BYTES),
    )(q_reps, p_reps)
    return loss[0, 0]


# ---------------------------------------------------------------------------
# Kernel 3 (eval): tiled similarity scores = q_reps @ p_reps.T (no transpose emitted)
# ---------------------------------------------------------------------------
def _scores_kernel(q_ref, p_ref, o_ref):
    o_ref[...] = jax.lax.dot_general(
        q_ref[...], p_ref[...], (((1,), (1,)), ((), ())),
        preferred_element_type=jnp.float32)


def pallas_scores(q_reps, p_reps, *, tp=512):
    Q, D = q_reps.shape
    P, D2 = p_reps.shape
    assert D == D2
    tp = _pick_tile(P, tp, 128)
    return pl.pallas_call(
        _scores_kernel,
        out_shape=jax.ShapeDtypeStruct((Q, P), jnp.float32),
        grid_spec=pltpu.PrefetchScalarGridSpec(
            num_scalar_prefetch=0,
            grid=(P // tp,),
            in_specs=[
                pl.BlockSpec((Q, D), lambda j: (0, 0)),
                pl.BlockSpec((tp, D), lambda j: (j, 0)),
            ],
            out_specs=pl.BlockSpec((Q, tp), lambda j: (0, j)),
        ),
        compiler_params=pltpu.CompilerParams(
            dimension_semantics=("parallel",),
            vmem_limit_bytes=_VMEM_LIMIT_BYTES),
    )(q_reps, p_reps)


# ---------------------------------------------------------------------------
# EncoderModel.forward equivalent (tied encoder, negatives_x_device=False)
# ---------------------------------------------------------------------------
def encoder_model_forward(q_hidden, p_hidden, w_enc, training=True):
    Q = q_hidden.shape[0]
    # fused tied-encoder call: one launch, W loaded once, rows of q & p share the grid
    x = jnp.concatenate([q_hidden, p_hidden], axis=0)        # [Q+P, H]
    reps = pallas_encode(x, w_enc)                           # [Q+P, D]
    q_reps, p_reps = reps[:Q], reps[Q:]
    if training:
        # training path: loss only; the [Q, P] scores matrix is never written to HBM
        loss = pallas_contrastive_loss(q_reps, p_reps)
        return {"loss": loss}
    scores = pallas_scores(q_reps, p_reps)
    return {"loss": None, "scores": scores, "q_reps": q_reps, "p_reps": p_reps}


if __name__ == "__main__":
    # Small but (8,128)-aligned shapes: Q=8 queries, P=16 passages (2 per query),
    # hidden H=256, rep dim D=128.
    Q, P, H, D = 8, 16, 256, 128

    key = jax.random.PRNGKey(0)
    k1, k2, k3 = jax.random.split(key, 3)
    q_hidden = jax.random.normal(k1, (Q, H), dtype=jnp.float32)
    p_hidden = jax.random.normal(k2, (P, H), dtype=jnp.float32)
    w_enc = jax.random.normal(k3, (H, D), dtype=jnp.float32) * 0.05

    out_train = encoder_model_forward(q_hidden, p_hidden, w_enc, training=True)
    loss = jax.block_until_ready(out_train["loss"])
    out_eval = encoder_model_forward(q_hidden, p_hidden, w_enc, training=False)
    scores = jax.block_until_ready(out_eval["scores"])
    q_reps = jax.block_until_ready(out_eval["q_reps"])
    p_reps = jax.block_until_ready(out_eval["p_reps"])

    # Pure-JAX reference.
    q_ref = q_hidden @ w_enc
    p_ref = p_hidden @ w_enc
    scores_ref = q_ref @ p_ref.T
    target = jnp.arange(Q) * (P // Q)
    logz = jax.scipy.special.logsumexp(scores_ref, axis=-1)
    loss_ref = jnp.mean(logz - scores_ref[jnp.arange(Q), target])

    assert scores.shape == (Q, P)
    assert jnp.allclose(q_reps, q_ref, atol=1e-3, rtol=1e-3)
    assert jnp.allclose(p_reps, p_ref, atol=1e-3, rtol=1e-3)
    assert jnp.allclose(scores, scores_ref, atol=1e-3, rtol=1e-3)
    assert jnp.allclose(loss, loss_ref, atol=1e-3, rtol=1e-3)

    print("KERNEL_OK")
</pallas_src>

<mosaic_0001>
module attributes {stable_mosaic.version = 11 : i64} {
  func.func @_encode_kernel(%arg0: i32, %arg1: i32, %arg2: i32, %arg3: memref<24x256xf32, #tpu.memory_space<vmem>>, %arg4: memref<256x128xf32, #tpu.memory_space<vmem>>, %arg5: memref<24x128xf32, #tpu.memory_space<vmem>>, %arg6: memref<24x128xf32, #tpu.memory_space<vmem>>) attributes {dimension_semantics = [#tpu.dimension_semantics<parallel>, #tpu.dimension_semantics<parallel>, #tpu.dimension_semantics<arbitrary>], iteration_bounds = array<i64: 1, 1, 1>, scalar_prefetch = 0 : i64, scratch_operands = 1 : i64, tpu.core_type = #tpu.core_type<tc>, window_params = [{transform_indices = @transform_0, window_bounds = array<i64: 24, 256>}, {transform_indices = @transform_1, window_bounds = array<i64: 256, 128>}, {transform_indices = @transform_2, window_bounds = array<i64: 24, 128>}]} {
    %c0_i32 = arith.constant 0 : i32
    %0 = arith.cmpi eq, %arg2, %c0_i32 : i32
    %1 = arith.extui %0 : i1 to i32
    %c0_i32_0 = arith.constant 0 : i32
    %2 = arith.cmpi ne, %1, %c0_i32_0 : i32
    scf.if %2 {
      %cst_10 = arith.constant 0.000000e+00 : f32
      %12 = vector.broadcast %cst_10 : f32 to vector<24x128xf32>
      %c0_11 = arith.constant 0 : index
      %c0_12 = arith.constant 0 : index
      %13 = vector.load %arg6[%c0_11, %c0_12] : memref<24x128xf32, #tpu.memory_space<vmem>>, vector<24x128xf32>
      tpu.vector_store %arg6[%c0_11, %c0_12], %12 {strides = array<i32>} : memref<24x128xf32, #tpu.memory_space<vmem>>, vector<24x128xf32>,
    } else {
    }
    %c0 = arith.constant 0 : index
    %c0_1 = arith.constant 0 : index
    %3 = vector.load %arg6[%c0, %c0_1] : memref<24x128xf32, #tpu.memory_space<vmem>>, vector<24x128xf32>
    %c0_2 = arith.constant 0 : index
    %c0_3 = arith.constant 0 : index
    %4 = vector.load %arg3[%c0_2, %c0_3] : memref<24x256xf32, #tpu.memory_space<vmem>>, vector<24x256xf32>
    %c0_4 = arith.constant 0 : index
    %c0_5 = arith.constant 0 : index
    %5 = vector.load %arg4[%c0_4, %c0_5] : memref<256x128xf32, #tpu.memory_space<vmem>>, vector<256x128xf32>
    %cst = arith.constant dense<0.000000e+00> : vector<24x128xf32>
    %6 = tpu.matmul %4, %5, %cst {dimension_numbers = #tpu.dot_dimension_numbers<[1], [0], [0], [1], [0, 0, 1, 1], [], []>} : vector<24x256xf32>, vector<256x128xf32>, vector<24x128xf32> -> vector<24x128xf32>
    %7 = arith.addf %3, %6 : vector<24x128xf32>
    %c0_6 = arith.constant 0 : index
    %c0_7 = arith.constant 0 : index
    %8 = vector.load %arg6[%c0_6, %c0_7] : memref<24x128xf32, #tpu.memory_space<vmem>>, vector<24x128xf32>
    tpu.vector_store %arg6[%c0_6, %c0_7], %7 {strides = array<i32>} : memref<24x128xf32, #tpu.memory_space<vmem>>, vector<24x128xf32>,
    %c0_i32_8 = arith.constant 0 : i32
    %9 = arith.cmpi eq, %arg2, %c0_i32_8 : i32
    %10 = arith.extui %9 : i1 to i32
    %c0_i32_9 = arith.constant 0 : i32
    %11 = arith.cmpi ne, %10, %c0_i32_9 : i32
    scf.if %11 {
      %c0_10 = arith.constant 0 : index
      %c0_11 = arith.constant 0 : index
      %12 = vector.load %arg6[%c0_10, %c0_11] : memref<24x128xf32, #tpu.memory_space<vmem>>, vector<24x128xf32>
      %c0_12 = arith.constant 0 : index
      %c0_13 = arith.constant 0 : index
      %13 = vector.load %arg5[%c0_12, %c0_13] : memref<24x128xf32, #tpu.memory_space<vmem>>, vector<24x128xf32>
      tpu.vector_store %arg5[%c0_12, %c0_13], %12 {strides = array<i32>} : memref<24x128xf32, #tpu.memory_space<vmem>>, vector<24x128xf32>,
    } else {
    }
    return
  }
  func.func @transform_0(%arg0: i32, %arg1: i32, %arg2: i32) -> (i32, i32) {
    %c0_i32 = arith.constant 0 : i32
    return %arg0, %arg2 : i32, i32
  }
  func.func @transform_1(%arg0: i32, %arg1: i32, %arg2: i32) -> (i32, i32) {
    %c0_i32 = arith.constant 0 : i32
    return %arg2, %arg1 : i32, i32
  }
  func.func @transform_2(%arg0: i32, %arg1: i32, %arg2: i32) -> (i32, i32) {
    %c0_i32 = arith.constant 0 : i32
    return %arg0, %arg1 : i32, i32
  }
}

</mosaic_0001>

<bundles_post_ra>
// kernel: tpu_custom_call.1
= control target key start
LH: loop header
LB: loop body
LE: loop exit
PB: predicated region body
PF: predicated region fallthrough
CT: control target
= control target key end

     0   :  { %7 = vsyncpa [#allocation4], 0  ;;  %s433_s0 = inlined_call_operand.hbm [shape: f32[24,256], index: 0, kind: input, shape index: {}]   ;;  %s434_s1 = inlined_call_operand.hbm [shape: f32[256,128], index: 1, kind: input, shape index: {}]   ;;  %s435_s2 = inlined_call_operand.hbm [shape: f32[24,128], index: 2, kind: output, shape index: {}]  }
   0x1   :  { %8 = vsyncpa [#allocation7], 0 }
   0x2   :  { %9 = vsyncpa [#allocation5], 0  ;;  %s369_s9 = smov [#allocation3]   ;;  %s297_s13 = scalar_lea.hbm %s433_s0, 768 }
   0x3   :  { %s15_s10 = sshll.u32 %s369_s9, 4  ;;  %p298_p0 = scmp.ne.s32.totalorder %s433_s0, %s297_s13  ;;  %s16_s10 = int_to_ptr.vmem [resolvable:$true] %s15_s10 }
   0x4   :  { %p301_p1 = scmp.lt.u32.totalorder %s297_s13, %s433_s0 }
   0x6   :  { %p303_p2 = pnand %p301_p1, %p298_p0 }
   0x8   :  { %306 = shalt.err (!%p303_p2)
}
   0x9   :  { %s307_s18 = scalar_lea.vmem %s16_s10, 768  ;;  %p312_p4 = scmp.lt.s32.totalorder %s16_s10, %s16_s10 }
   0xa   :  { %p308_p3 = scmp.ne.s32.totalorder %s16_s10, %s307_s18  ;;  %p313_p5 = scmp.lt.s32.totalorder %s307_s18, %s307_s18 }
   0xc   :  { %p314_p6 = por %p313_p5, %p312_p4 }
   0xe   :  { %p315_p7 = pnand %p314_p6, %p308_p3 }
  0x10   :  { %318 = shalt.err (!%p315_p7)
}
  0x11   :  { %s370_s19 = smov 256   ;;  %s371_s20 = smov 16  }
  0x12   :  { %21 = dma.hbm_to_vmem [thread:$0]  %s433_s0, 768, %s16_s10, [#allocation4], %s370_s19, %s370_s19, %s371_s20  }
  0x13   :  { %s372_s23 = smov [#allocation6]   ;;  %s319_s27 = scalar_lea.hbm %s434_s1, 4096 }
  0x14   :  { %s27_s24 = sshll.u32 %s372_s23, 4  ;;  %p320_p8 = scmp.ne.s32.totalorder %s434_s1, %s319_s27  ;;  %s28_s24 = int_to_ptr.vmem [resolvable:$true] %s27_s24 }
  0x15   :  { %p323_p9 = scmp.lt.u32.totalorder %s319_s27, %s434_s1 }
  0x17   :  { %p325_p10 = pnand %p323_p9, %p320_p8 }
  0x19   :  { %328 = shalt.err (!%p325_p10)
}
  0x1a   :  { %s329_s4 = scalar_lea.vmem %s28_s24, 4096  ;;  %p334_p12 = scmp.lt.s32.totalorder %s28_s24, %s28_s24 }
  0x1b   :  { %p330_p11 = scmp.ne.s32.totalorder %s28_s24, %s329_s4  ;;  %p335_p13 = scmp.lt.s32.totalorder %s329_s4, %s329_s4 }
  0x1d   :  { %p336_p0 = por %p335_p13, %p334_p12 }
  0x1f   :  { %p337_p1 = pnand %p336_p0, %p330_p11 }
  0x21   :  { %340 = shalt.err (!%p337_p1)
}
  0x22   :  { %s373_s0 = smov 128   ;;  %s374_s5 = smov 8  }
  0x23   :  { %33 = dma.hbm_to_vmem [thread:$0]  %s434_s1, 4096, %s28_s24, [#allocation7], %s373_s0, %s373_s0, %s374_s5  }
  0x24   :  { %363 = dma.done.wait [#allocation4], 768  }
  0x25   :  { %364 = vsyncadd [#allocation4], 4294966528 }
  0x26   :  { %365 = dma.done.wait [#allocation7], 4096  }
  0x27   :  { %366 = vsyncadd [#allocation7], 4294963200  ;;  %v72_v0 = vld [vmem:[#allocation6 + $0x80] sm:$0xff]  ;;  %v73_v1 = vld [vmem:[#allocation6 + $0x88] sm:$0xff]  ;;  %s375_s1 = smov [#allocation8]  }
  0x28   :  { %v56_v2 = vld [vmem:[#allocation6] sm:$0xff]  ;;  %v242_v3 = vpack.c.bf16 %v73_v1, %v72_v0  ;;  %v57_v4 = vld [vmem:[#allocation6 + $0x8] sm:$0xff]  ;;  %v74_v5 = vld [vmem:[#allocation6 + $0x90] sm:$0xff]  ;;  %s188_s8 = sshll.u32 %s375_s1, 4  ;;  %s189_s8 = int_to_ptr.vmem [resolvable:$true] %s188_s8 }
  0x29   :  { %v75_v6 = vld [vmem:[#allocation6 + $0x98] sm:$0xff]  ;;  %v244_v7 = vpack.c.bf16 %v57_v4, %v56_v2  ;;  %v58_v9 = vld [vmem:[#allocation6 + $0x10] sm:$0xff]  ;;  %v76_v11 = vld [vmem:[#allocation6 + $0xa0] sm:$0xff]  ;;  %s341_s9 = scalar_lea.vmem %s189_s8, 384  ;;  %p346_p3 = scmp.lt.s32.totalorder %s189_s8, %s189_s8 }
  0x2a   :  { %v246_v8 = vpack.c.bf16 %v75_v6, %v74_v5  ;;  %v59_v10 = vld [vmem:[#allocation6 + $0x18] sm:$0xff]  ;;  %274 = vmatprep.subr.bf16.mxu1 %v242_v3  ;;  %243 = vmatprep.subr.bf16.mxu0 %v242_v3  ;;  %v77_v12 = vld [vmem:[#allocation6 + $0xa8] sm:$0xff]  ;;  %v60_v15 = vld [vmem:[#allocation6 + $0x20] sm:$0xff]  ;;  %p342_p2 = scmp.ne.s32.totalorder %s189_s8, %s341_s9  ;;  %p347_p4 = scmp.lt.s32.totalorder %s341_s9, %s341_s9 }
  0x2b   :  { %282 = vmatpush3.bf16.msra.mxu1 %v244_v7  ;;  %245 = vmatpush3.bf16.msra.mxu0 %v244_v7  ;;  %v248_v13 = vpack.c.bf16 %v59_v10, %v58_v9  ;;  %v250_v14 = vpack.c.bf16 %v77_v12, %v76_v11  ;;  %v61_v16 = vld [vmem:[#allocation6 + $0x28] sm:$0xff]  ;;  %v78_v17 = vld [vmem:[#allocation6 + $0xb0] sm:$0xff]  ;;  %v79_v18 = vld [vmem:[#allocation6 + $0xb8] sm:$0xff] }
  0x2c   :  { %275 = vmatprep.subr.bf16.mxu1 %v246_v8  ;;  %247 = vmatprep.subr.bf16.mxu0 %v246_v8  ;;  %v252_v19 = vpack.c.bf16 %v61_v16, %v60_v15  ;;  %v254_v20 = vpack.c.bf16 %v79_v18, %v78_v17  ;;  %v62_v21 = vld [vmem:[#allocation6 + $0x30] sm:$0xff]  ;;  %v63_v22 = vld [vmem:[#allocation6 + $0x38] sm:$0xff]  ;;  %v80_v23 = vld [vmem:[#allocation6 + $0xc0] sm:$0xff]  ;;  %p348_p5 = por %p347_p4, %p346_p3 }
  0x2d   :  { %v81_v24 = vld [vmem:[#allocation6 + $0xc8] sm:$0xff]  ;;  %v51_v26 = vld [vmem:[#allocation3 + $0x8] sm:$0xff]  ;;  %v256_v27 = vpack.c.bf16 %v63_v22, %v62_v21  ;;  %v64_v29 = vld [vmem:[#allocation6 + $0x40] sm:$0xff] }
  0x2e   :  { %v53_v25 = vld [vmem:[#allocation3 + $0x18] sm:$0xff]  ;;  %v258_v28 = vpack.c.bf16 %v81_v24, %v80_v23  ;;  %v82_v31 = vld [vmem:[#allocation6 + $0xd0] sm:$0xff]  ;;  %v83_v32 = vld [vmem:[#allocation6 + $0xd8] sm:$0xff]  ;;  %152 = vmatprep.mubr.f32.mxu0 %v51_v26  ;;  %p349_p6 = pnand %p348_p5, %p342_p2 }
  0x2f   :  { %283 = vmatpush3.bf16.msra.mxu1 %v248_v13  ;;  %249 = vmatpush3.bf16.msra.mxu0 %v248_v13  ;;  %v65_v30 = vld [vmem:[#allocation6 + $0x48] sm:$0xff]  ;;  %v262_v34 = vpack.c.bf16 %v83_v32, %v82_v31  ;;  %v66_v35 = vld [vmem:[#allocation6 + $0x50] sm:$0xff]  ;;  %v67_v36 = vld [vmem:[#allocation6 + $0x58] sm:$0xff] }
  0x30   :  { %276 = vmatprep.subr.bf16.mxu1 %v250_v14  ;;  %251 = vmatprep.subr.bf16.mxu0 %v250_v14  ;;  %v260_v33 = vpack.c.bf16 %v65_v30, %v64_v29  ;;  %v84_v37 = vld [vmem:[#allocation6 + $0xe0] sm:$0xff]  ;;  %v85_v38 = vld [vmem:[#allocation6 + $0xe8] sm:$0xff]  ;;  %v264_v39 = vpack.c.bf16 %v67_v36, %v66_v35  ;;  %v86_v43 = vld [vmem:[#allocation6 + $0xf0] sm:$0xff] }
  0x31   :  { %157 = vmatprep.mubr.f32.mxu1 %v53_v25  ;;  %v266_v40 = vpack.c.bf16 %v85_v38, %v84_v37  ;;  %v68_v41 = vld [vmem:[#allocation6 + $0x60] sm:$0xff]  ;;  %v69_v42 = vld [vmem:[#allocation6 + $0x68] sm:$0xff]  ;;  %v87_v44 = vld [vmem:[#allocation6 + $0xf8] sm:$0xff] }
  0x32   :  { %v268_v45 = vpack.c.bf16 %v69_v42, %v68_v41  ;;  %v270_v46 = vpack.c.bf16 %v87_v44, %v86_v43  ;;  %v70_v47 = vld [vmem:[#allocation6 + $0x70] sm:$0xff]  ;;  %v71_v48 = vld [vmem:[#allocation6 + $0x78] sm:$0xff]  ;;  %v52_v50 = vld [vmem:[#allocation3 + $0x10] sm:$0xff] }
  0x33   :  { %284 = vmatpush3.bf16.msra.mxu1 %v252_v19  ;;  %253 = vmatpush3.bf16.msra.mxu0 %v252_v19  ;;  %v272_v49 = vpack.c.bf16 %v71_v48, %v70_v47  ;;  %v50_v51 = vld [vmem:[#allocation3] sm:$0xff]  ;;  %v55_v52 = vld [vmem:[#allocation3 + $0x28] sm:$0xff] }
  0x34   :  { %277 = vmatprep.subr.bf16.mxu1 %v254_v20  ;;  %255 = vmatprep.subr.bf16.mxu0 %v254_v20  ;;  %v54_v53 = vld [vmem:[#allocation3 + $0x20] sm:$0xff] }
  0x37   :  { %285 = vmatpush3.bf16.msra.mxu1 %v256_v27  ;;  %257 = vmatpush3.bf16.msra.mxu0 %v256_v27 }
  0x38   :  { %278 = vmatprep.subr.bf16.mxu1 %v258_v28  ;;  %259 = vmatprep.subr.bf16.mxu0 %v258_v28 }
  0x3b   :  { %286 = vmatpush3.bf16.msra.mxu1 %v260_v33  ;;  %261 = vmatpush3.bf16.msra.mxu0 %v260_v33 }
  0x3c   :  { %279 = vmatprep.subr.bf16.mxu1 %v262_v34  ;;  %263 = vmatprep.subr.bf16.mxu0 %v262_v34 }
  0x3f   :  { %287 = vmatpush3.bf16.msra.mxu1 %v264_v39  ;;  %265 = vmatpush3.bf16.msra.mxu0 %v264_v39 }
  0x40   :  { %280 = vmatprep.subr.bf16.mxu1 %v266_v40  ;;  %267 = vmatprep.subr.bf16.mxu0 %v266_v40 }
  0x43   :  { %288 = vmatpush3.bf16.msra.mxu1 %v268_v45  ;;  %269 = vmatpush3.bf16.msra.mxu0 %v268_v45 }
  0x44   :  { %281 = vmatprep.subr.bf16.mxu1 %v270_v46  ;;  %271 = vmatprep.subr.bf16.mxu0 %v270_v46 }
  0x47   :  { %289 = vmatpush3.bf16.msra.mxu1 %v272_v49  ;;  %273 = vmatpush3.bf16.msra.mxu0 %v272_v49 }
  0x4a   :  { %158 = vmatmul.mubr.f32.vlgmr.msra.gmra.mrb[0].mxu1 %v52_v50  ;;  %153 = vmatmul.mubr.f32.vlgmr.msra.gmra.mrb[0].mxu0 %v50_v51 }
  0x4b   :  { %162 = vmatprep.mubr.f32.mxu1 %v55_v52 }
  0x4e   :  { %163 = vmatmul.mubr.f32.gmra.mrb[2].mxu1 %v54_v53 }
 0x11d   :  { %v236_v54 = vpop.f32.mrb[0].mxu1  ;;  %v233_v55 = vpop.f32.mrb[0].mxu0 }
 0x11e   :  { %v237_v56 = vpop.f32.mrb[1].mxu1  ;;  %v234_v57 = vpop.f32.mrb[1].mxu0 }
 0x11f   :  { %v238_v58 = vadd.f32 %v237_v56, %v236_v54  ;;  %v235_v59 = vadd.f32 %v234_v57, %v233_v55 }
 0x121   :  { %181 = vst [vmem:[#allocation8 + $0x8] sm:$0xff] %v238_v58  ;;  %180 = vst [vmem:[#allocation8] sm:$0xff] %v235_v59  ;;  %v239_v60 = vpop.f32.mrb[2].mxu1 }
 0x122   :  { %v240_v61 = vpop.f32.mrb[3].mxu1 }
 0x123   :  { %v241_v62 = vadd.f32 %v240_v61, %v239_v60 }
 0x125   :  { %182 = vst [vmem:[#allocation8 + $0x10] sm:$0xff] %v241_v62 }
 0x126   :  { %352 = shalt.err (!%p349_p6)
}
 0x127   :  { %s353_s12 = scalar_lea.hbm %s435_s2, 384 }
 0x128   :  { %p354_p7 = scmp.ne.s32.totalorder %s435_s2, %s353_s12  ;;  %p357_p8 = scmp.lt.u32.totalorder %s353_s12, %s435_s2 }
 0x12a   :  { %p359_p9 = pnand %p357_p8, %p354_p7 }
 0x12c   :  { %362 = shalt.err (!%p359_p9)
}
 0x12d   :  { %194 = dma.vmem_to_hbm [thread:$0]  %s189_s8, 384, %s435_s2, [#allocation5], %s373_s0, %s373_s0, %s374_s5  }
 0x12e   :  { %367 = dma.done.wait [#allocation5], 384  }
 0x12f   :  { %368 = vsyncadd [#allocation5], 4294966912 }
 0x130   :  { %198 = vsyncpa [#allocation4], 1 }
 0x131   :  { %199 = vsyncpa [#allocation7], 1 }
 0x132   :  { %200 = vsyncpa [#allocation5], 1 }

</bundles_post_ra>
